<compile_context>
chip_gen: v6e
topology: v6e:2x2x1
jax: 0.10.0
libtpu: 0.0.40
codegen_flags: <defaults>
</compile_context>

<pallas_src>
import math

import jax
import jax.numpy as jnp
from jax.experimental import pallas as pl
from jax.experimental.pallas import tpu as pltpu


def _round_up(x, m):
    return ((x + m - 1) // m) * m


def _cdiv(a, b):
    return -(-a // b)


def compute_pad(input_dim, cond_dim, hidden_dim, latent_dim, label_dim):
    return _round_up(
        max(latent_dim + input_dim + cond_dim,            # input slab [eps|x|c]
            hidden_dim,
            2 * hidden_dim,                               # fused dec+aux hidden
            2 * latent_dim,                               # head [logvar|mu]
            2 * latent_dim + input_dim + label_dim),      # out slab [lv|mu|xp|p]
        128)


def _choose_batch_tile(batch, max_tile=1024, split_threshold=1024):
    """Batch tile: multiple of 8, <=1024, minimal padding for ragged batches,
    and >=2 grid steps for large batches so both v7x TensorCores get work."""
    b8 = _round_up(max(batch, 1), 8)
    n_tiles = _cdiv(b8, max_tile)
    if n_tiles == 1 and b8 >= split_threshold:
        n_tiles = 2
    return min(max_tile, _round_up(_cdiv(b8, n_tiles), 8))


# ---------------------------------------------------------------------------
# Kernel
# ---------------------------------------------------------------------------
def make_reg_vae_kernel(*, num_hidden):
    n_enc = 1 + num_hidden           # encoder Linear->tanh layers
    n_layers = 2 * num_hidden + 5    # enc + head + (W_mu, W_t) + middles + out

    def kernel(x_ref, w_ref, b_ref, o_ref):
        x = x_ref[...]                                    # [TB,pad] f32 [eps|x|c|0]
        h = x.astype(jnp.bfloat16)

        # ----- encoder: (1 + num_hidden) x [Linear -> tanh] (bf16 MXU) -----
        for l in range(n_enc):
            h = jnp.tanh(
                jnp.dot(h, w_ref[l], preferred_element_type=jnp.float32)
                + b_ref[l]).astype(jnp.bfloat16)

        # ----- fused head: ml = [logvar | mu | 0]  (f32) -----
        ml = (jnp.dot(h, w_ref[n_enc], preferred_element_type=jnp.float32)
              + b_ref[n_enc])

        # ----- reparameterize folded into the first fused dec/aux layer -----
        # t = slab * exp(0.5*ml) -> lanes: [eps*std | junk | c | 0]
        t = x * jnp.exp(0.5 * ml)
        h2 = jnp.tanh(
            jnp.dot(ml.astype(jnp.bfloat16), w_ref[n_enc + 1],
                    preferred_element_type=jnp.float32)
            + jnp.dot(t.astype(jnp.bfloat16), w_ref[n_enc + 2],
                      preferred_element_type=jnp.float32)
            + b_ref[n_enc + 2]).astype(jnp.bfloat16)

        # park [logvar|mu] in the output block now -> ml's vregs are freed
        # across the decoder/aux chain (its lanes >= 2L are zero).
        o_ref[...] = ml

        # ----- fused decoder + aux middle layers (block-diagonal weights) --
        for l in range(n_enc + 3, n_layers - 1):
            h2 = jnp.tanh(
                jnp.dot(h2, w_ref[l], preferred_element_type=jnp.float32)
                + b_ref[l]).astype(jnp.bfloat16)

        # output layer columns are pre-shifted by 2L: out = [0|0| xp | p |0]
        out = (jnp.dot(h2, w_ref[n_layers - 1],
                       preferred_element_type=jnp.float32)
               + b_ref[n_layers - 1])

        # final slab = [logvar | mu | xp | p | 0]  (single VPU add, dense vst)
        o_ref[...] = o_ref[...] + out

    return kernel


# ---------------------------------------------------------------------------
# Deterministic parameter init (matches nn.Linear fan-in uniform scheme);
# layout mirrors the PyTorch module exactly (unfused, per-layer).
# ---------------------------------------------------------------------------
def init_params(key, input_dim, cond_dim, hidden_dim, latent_dim, label_dim,
                num_hidden):
    def linear(k, fan_in, fan_out):
        k1, k2 = jax.random.split(k)
        bound = 1.0 / math.sqrt(fan_in)
        w = jax.random.uniform(k1, (fan_in, fan_out), jnp.float32, -bound, bound)
        b = jax.random.uniform(k2, (1, fan_out), jnp.float32, -bound, bound)
        return w, b

    keys = iter(jax.random.split(key, 64))
    params = []

    # encoder
    w, b = linear(next(keys), input_dim + cond_dim, hidden_dim); params += [w, b]
    for _ in range(num_hidden):
        w, b = linear(next(keys), hidden_dim, hidden_dim); params += [w, b]
    # mu, logvar heads
    for _ in range(2):
        w, b = linear(next(keys), hidden_dim, latent_dim); params += [w, b]
    # decoder
    w, b = linear(next(keys), latent_dim + cond_dim, hidden_dim); params += [w, b]
    for _ in range(num_hidden):
        w, b = linear(next(keys), hidden_dim, hidden_dim); params += [w, b]
    w, b = linear(next(keys), hidden_dim, input_dim); params += [w, b]
    # aux
    w, b = linear(next(keys), latent_dim + cond_dim, hidden_dim); params += [w, b]
    for _ in range(num_hidden):
        w, b = linear(next(keys), hidden_dim, hidden_dim); params += [w, b]
    w, b = linear(next(keys), hidden_dim, label_dim); params += [w, b]
    return params


# ---------------------------------------------------------------------------
# Pack per-layer params into fused, zero-padded slabs with the lane layouts
# the kernel expects.  Weights -> bf16, biases stay f32 (negligible size).
# ---------------------------------------------------------------------------
def pack_params(params, *, num_hidden, input_dim, cond_dim, hidden_dim,
                latent_dim, label_dim, pad):
    D, C, H, L, P = input_dim, cond_dim, hidden_dim, latent_dim, label_dim
    it = iter(params)

    def take():
        return next(it), next(it)

    def new_w():
        return jnp.zeros((pad, pad), jnp.float32)

    def new_b():
        return jnp.zeros((1, pad), jnp.float32)

    Ws, Bs = [], []

    # encoder layer 0: [x|c] rows live at slab lanes [L, L+D+C)
    w, b = take()
    Ws.append(new_w().at[L:L + D + C, :H].set(w))
    Bs.append(new_b().at[:, :H].set(b))

    # encoder middle layers
    for _ in range(num_hidden):
        w, b = take()
        Ws.append(new_w().at[:H, :H].set(w))
        Bs.append(new_b().at[:, :H].set(b))

    # fused head: logvar at cols [0,L), mu at cols [L,2L)
    wmu, bmu = take()
    wlv, blv = take()
    Ws.append(new_w().at[:H, :L].set(wlv).at[:H, L:2 * L].set(wmu))
    Bs.append(new_b().at[:, :L].set(blv).at[:, L:2 * L].set(bmu))

    dec = [take() for _ in range(num_hidden + 2)]
    aux = [take() for _ in range(num_hidden + 2)]

    # first dec/aux layer split into (W_mu, W_t) to fold reparameterization in
    (wd0, bd0), (wa0, ba0) = dec[0], aux[0]
    wz = jnp.concatenate([wd0[:L], wa0[:L]], axis=1)     # z rows   [L, 2H]
    wc = jnp.concatenate([wd0[L:], wa0[L:]], axis=1)     # c rows   [C, 2H]
    b0 = jnp.concatenate([bd0, ba0], axis=1)             # [1, 2H]

    # W_mu consumes ml (mu at lanes [L,2L)) -> mu @ Wz; zero bias slot
    Ws.append(new_w().at[L:2 * L, :2 * H].set(wz))
    Bs.append(new_b())

    # W_t consumes t = slab*exp(0.5*ml): eps*std at [0,L), c at [L+D, L+D+C)
    Ws.append(new_w().at[:L, :2 * H].set(wz)
                    .at[L + D:L + D + C, :2 * H].set(wc))
    Bs.append(new_b().at[:, :2 * H].set(b0))

    # block-diagonal middle layers
    for i in range(1, num_hidden + 1):
        (wd, bd), (wa, ba) = dec[i], aux[i]
        Ws.append(new_w().at[:H, :H].set(wd).at[H:2 * H, H:2 * H].set(wa))
        Bs.append(new_b().at[:, :H].set(bd).at[:, H:2 * H].set(ba))

    # block-diagonal output layer, columns shifted by 2L -> [.. | xp | p]
    (wd, bd), (wa, ba) = dec[-1], aux[-1]
    Ws.append(new_w().at[:H, 2 * L:2 * L + D].set(wd)
                    .at[H:2 * H, 2 * L + D:2 * L + D + P].set(wa))
    Bs.append(new_b().at[:, 2 * L:2 * L + D].set(bd)
                    .at[:, 2 * L + D:2 * L + D + P].set(ba))

    return (jnp.stack(Ws).astype(jnp.bfloat16),   # [NL, pad, pad] bf16
            jnp.stack(Bs))                        # [NL, 1,   pad] f32


# ---------------------------------------------------------------------------
# Wrapper
# ---------------------------------------------------------------------------
def reg_vae_forward(x, c, eps, w_stack, b_stack, *, num_hidden, input_dim,
                    cond_dim, latent_dim, label_dim, pad):
    B = x.shape[0]
    D, C, L, P = input_dim, cond_dim, latent_dim, label_dim
    TB = _choose_batch_tile(B)
    B_pad = _round_up(B, TB)
    n_layers = w_stack.shape[0]

    # one fused lane-concat + pad (no zeros + scatter chain): [eps | x | c | 0]
    xin = jnp.concatenate([eps, x, c], axis=1).astype(jnp.float32)
    xin = jnp.pad(xin, ((0, B_pad - B), (0, pad - (L + D + C))))

    kernel = make_reg_vae_kernel(num_hidden=num_hidden)

    # NOTE: default scoped-VMEM / double-buffering is ample at these sizes;
    # if hidden_dim scales (v7x, 64 MiB VMEM), single-buffer the resident
    # W/B specs and set vmem_limit_bytes explicitly.
    slab = pl.pallas_call(
        kernel,
        out_shape=jax.ShapeDtypeStruct((B_pad, pad), jnp.float32),
        grid_spec=pltpu.PrefetchScalarGridSpec(
            num_scalar_prefetch=0,
            grid=(B_pad // TB,),
            in_specs=[
                pl.BlockSpec((TB, pad), lambda i: (i, 0)),                # inputs (batch-tiled)
                pl.BlockSpec((n_layers, pad, pad), lambda i: (0, 0, 0)),  # bf16 weights (resident)
                pl.BlockSpec((n_layers, 1, pad), lambda i: (0, 0, 0)),    # f32 biases  (resident)
            ],
            out_specs=pl.BlockSpec((TB, pad), lambda i: (i, 0)),
        ),
        compiler_params=pltpu.CompilerParams(
            dimension_semantics=("parallel",)),
    )(xin, w_stack, b_stack)

    logvar = slab[:B, :L]
    mu = slab[:B, L:2 * L]
    xp = slab[:B, 2 * L:2 * L + D]
    p = slab[:B, 2 * L + D:2 * L + D + P]
    return xp, mu, logvar, p


# ---------------------------------------------------------------------------
# Pure-JAX reference (mirrors the PyTorch forward exactly, unfused f32 params)
# ---------------------------------------------------------------------------
def reg_vae_reference(x, c, eps, params, *, num_hidden):
    it = iter(params)
    h = jnp.concatenate([x, c], axis=1)
    for _ in range(1 + num_hidden):
        w, b = next(it), next(it)
        h = jnp.tanh(h @ w + b)
    w, b = next(it), next(it)
    mu = h @ w + b
    w, b = next(it), next(it)
    logvar = h @ w + b
    z = mu + eps * jnp.exp(0.5 * logvar)

    def head(it_):
        hh = jnp.concatenate([z, c], axis=1)
        for _ in range(num_hidden + 1):
            w_, b_ = next(it_), next(it_)
            hh = jnp.tanh(hh @ w_ + b_)
        w_, b_ = next(it_), next(it_)
        return hh @ w_ + b_

    xp = head(it)
    p = head(it)
    return xp, mu, logvar, p


# ---------------------------------------------------------------------------
if __name__ == "__main__":
    # Small shapes consistent with the module's constructor (scaled down).
    input_dim, cond_dim, hidden_dim = 16, 8, 32
    latent_dim, label_dim, num_hidden = 2, 2, 3

    key = jax.random.PRNGKey(0)
    k_params, k1, k2, k3, k4, k5, k6 = jax.random.split(key, 7)

    params = init_params(k_params, input_dim, cond_dim, hidden_dim,
                         latent_dim, label_dim, num_hidden)
    pad = compute_pad(input_dim, cond_dim, hidden_dim, latent_dim, label_dim)
    w_stack, b_stack = pack_params(
        params, num_hidden=num_hidden, input_dim=input_dim, cond_dim=cond_dim,
        hidden_dim=hidden_dim, latent_dim=latent_dim, label_dim=label_dim,
        pad=pad)

    kwargs = dict(num_hidden=num_hidden, input_dim=input_dim,
                  cond_dim=cond_dim, latent_dim=latent_dim,
                  label_dim=label_dim, pad=pad)

    # bf16 MXU path -> tolerance looser than a pure-f32 kernel would need.
    TOL = dict(atol=5e-2, rtol=5e-2)

    def run_and_check(B, kx, kc, ke):
        x = jax.random.normal(kx, (B, input_dim), jnp.float32)
        c = jax.random.normal(kc, (B, cond_dim), jnp.float32)
        # TODO(synk): torch.randn_like inside reparameterize is replaced by an
        # explicit eps input (deterministic noise passed to the kernel).
        eps = jax.random.normal(ke, (B, latent_dim), jnp.float32)
        out = reg_vae_forward(x, c, eps, w_stack, b_stack, **kwargs)
        jax.block_until_ready(out)
        ref = reg_vae_reference(x, c, eps, params, num_hidden=num_hidden)
        for a, b in zip(out, ref):
            assert a.shape == b.shape, "shape mismatch vs reference"
            assert jnp.allclose(a, b, **TOL), "mismatch vs reference"

    run_and_check(8, k1, k2, k3)        # small batch, single grid step
    run_and_check(1032, k4, k5, k6)     # ragged batch, >=2 grid steps (v7x 2 TCs)
    print("KERNEL_OK")
</pallas_src>

<mosaic_0001>
module attributes {stable_mosaic.version = 11 : i64} {
  func.func @kernel(%arg0: i32, %arg1: memref<8x128xf32, #tpu.memory_space<vmem>>, %arg2: memref<11x128x128xbf16, #tpu.memory_space<vmem>>, %arg3: memref<11x1x128xf32, #tpu.memory_space<vmem>>, %arg4: memref<8x128xf32, #tpu.memory_space<vmem>>) attributes {dimension_semantics = [#tpu.dimension_semantics<parallel>], iteration_bounds = array<i64: 1>, scalar_prefetch = 0 : i64, scratch_operands = 0 : i64, tpu.core_type = #tpu.core_type<tc>, window_params = [{transform_indices = @transform_0, window_bounds = array<i64: 8, 128>}, {pipeline_mode = #tpu.pipeline_mode<synchronous>, transform_indices = @transform_1, window_bounds = array<i64: 11, 128, 128>}, {pipeline_mode = #tpu.pipeline_mode<synchronous>, transform_indices = @transform_2, window_bounds = array<i64: 11, 1, 128>}, {transform_indices = @transform_3, window_bounds = array<i64: 8, 128>}]} {
    %c0 = arith.constant 0 : index
    %c0_0 = arith.constant 0 : index
    %0 = vector.load %arg1[%c0, %c0_0] : memref<8x128xf32, #tpu.memory_space<vmem>>, vector<8x128xf32>
    %1 = arith.truncf %0 : vector<8x128xf32> to vector<8x128xbf16>
    %c0_1 = arith.constant 0 : index
    %c0_2 = arith.constant 0 : index
    %c0_3 = arith.constant 0 : index
    %2 = vector.load %arg2[%c0_1, %c0_2, %c0_3] : memref<11x128x128xbf16, #tpu.memory_space<vmem>>, vector<1x128x128xbf16>
    %3 = vector.shape_cast %2 : vector<1x128x128xbf16> to vector<128x128xbf16>
    %cst = arith.constant dense<0.000000e+00> : vector<8x128xf32>
    %4 = tpu.matmul %1, %3, %cst {dimension_numbers = #tpu.dot_dimension_numbers<[1], [0], [0], [1], [0, 0, 1, 1], [], []>} : vector<8x128xbf16>, vector<128x128xbf16>, vector<8x128xf32> -> vector<8x128xf32>
    %c0_4 = arith.constant 0 : index
    %c0_5 = arith.constant 0 : index
    %c0_6 = arith.constant 0 : index
    %5 = vector.load %arg3[%c0_4, %c0_5, %c0_6] : memref<11x1x128xf32, #tpu.memory_space<vmem>>, vector<1x1x128xf32>
    %6 = vector.shape_cast %5 : vector<1x1x128xf32> to vector<1x128xf32>
    %7 = vector.broadcast %6 : vector<1x128xf32> to vector<8x128xf32>
    %8 = arith.addf %4, %7 : vector<8x128xf32>
    %9 = math.tanh %8 : vector<8x128xf32>
    %10 = arith.truncf %9 : vector<8x128xf32> to vector<8x128xbf16>
    %c1 = arith.constant 1 : index
    %c0_7 = arith.constant 0 : index
    %c0_8 = arith.constant 0 : index
    %11 = vector.load %arg2[%c1, %c0_7, %c0_8] : memref<11x128x128xbf16, #tpu.memory_space<vmem>>, vector<1x128x128xbf16>
    %12 = vector.shape_cast %11 : vector<1x128x128xbf16> to vector<128x128xbf16>
    %cst_9 = arith.constant dense<0.000000e+00> : vector<8x128xf32>
    %13 = tpu.matmul %10, %12, %cst_9 {dimension_numbers = #tpu.dot_dimension_numbers<[1], [0], [0], [1], [0, 0, 1, 1], [], []>} : vector<8x128xbf16>, vector<128x128xbf16>, vector<8x128xf32> -> vector<8x128xf32>
    %c1_10 = arith.constant 1 : index
    %c0_11 = arith.constant 0 : index
    %c0_12 = arith.constant 0 : index
    %14 = vector.load %arg3[%c1_10, %c0_11, %c0_12] : memref<11x1x128xf32, #tpu.memory_space<vmem>>, vector<1x1x128xf32>
    %15 = vector.shape_cast %14 : vector<1x1x128xf32> to vector<1x128xf32>
    %16 = vector.broadcast %15 : vector<1x128xf32> to vector<8x128xf32>
    %17 = arith.addf %13, %16 : vector<8x128xf32>
    %18 = math.tanh %17 : vector<8x128xf32>
    %19 = arith.truncf %18 : vector<8x128xf32> to vector<8x128xbf16>
    %c2 = arith.constant 2 : index
    %c0_13 = arith.constant 0 : index
    %c0_14 = arith.constant 0 : index
    %20 = vector.load %arg2[%c2, %c0_13, %c0_14] : memref<11x128x128xbf16, #tpu.memory_space<vmem>>, vector<1x128x128xbf16>
    %21 = vector.shape_cast %20 : vector<1x128x128xbf16> to vector<128x128xbf16>
    %cst_15 = arith.constant dense<0.000000e+00> : vector<8x128xf32>
    %22 = tpu.matmul %19, %21, %cst_15 {dimension_numbers = #tpu.dot_dimension_numbers<[1], [0], [0], [1], [0, 0, 1, 1], [], []>} : vector<8x128xbf16>, vector<128x128xbf16>, vector<8x128xf32> -> vector<8x128xf32>
    %c2_16 = arith.constant 2 : index
    %c0_17 = arith.constant 0 : index
    %c0_18 = arith.constant 0 : index
    %23 = vector.load %arg3[%c2_16, %c0_17, %c0_18] : memref<11x1x128xf32, #tpu.memory_space<vmem>>, vector<1x1x128xf32>
    %24 = vector.shape_cast %23 : vector<1x1x128xf32> to vector<1x128xf32>
    %25 = vector.broadcast %24 : vector<1x128xf32> to vector<8x128xf32>
    %26 = arith.addf %22, %25 : vector<8x128xf32>
    %27 = math.tanh %26 : vector<8x128xf32>
    %28 = arith.truncf %27 : vector<8x128xf32> to vector<8x128xbf16>
    %c3 = arith.constant 3 : index
    %c0_19 = arith.constant 0 : index
    %c0_20 = arith.constant 0 : index
    %29 = vector.load %arg2[%c3, %c0_19, %c0_20] : memref<11x128x128xbf16, #tpu.memory_space<vmem>>, vector<1x128x128xbf16>
    %30 = vector.shape_cast %29 : vector<1x128x128xbf16> to vector<128x128xbf16>
    %cst_21 = arith.constant dense<0.000000e+00> : vector<8x128xf32>
    %31 = tpu.matmul %28, %30, %cst_21 {dimension_numbers = #tpu.dot_dimension_numbers<[1], [0], [0], [1], [0, 0, 1, 1], [], []>} : vector<8x128xbf16>, vector<128x128xbf16>, vector<8x128xf32> -> vector<8x128xf32>
    %c3_22 = arith.constant 3 : index
    %c0_23 = arith.constant 0 : index
    %c0_24 = arith.constant 0 : index
    %32 = vector.load %arg3[%c3_22, %c0_23, %c0_24] : memref<11x1x128xf32, #tpu.memory_space<vmem>>, vector<1x1x128xf32>
    %33 = vector.shape_cast %32 : vector<1x1x128xf32> to vector<1x128xf32>
    %34 = vector.broadcast %33 : vector<1x128xf32> to vector<8x128xf32>
    %35 = arith.addf %31, %34 : vector<8x128xf32>
    %36 = math.tanh %35 : vector<8x128xf32>
    %37 = arith.truncf %36 : vector<8x128xf32> to vector<8x128xbf16>
    %c4 = arith.constant 4 : index
    %c0_25 = arith.constant 0 : index
    %c0_26 = arith.constant 0 : index
    %38 = vector.load %arg2[%c4, %c0_25, %c0_26] : memref<11x128x128xbf16, #tpu.memory_space<vmem>>, vector<1x128x128xbf16>
    %39 = vector.shape_cast %38 : vector<1x128x128xbf16> to vector<128x128xbf16>
    %cst_27 = arith.constant dense<0.000000e+00> : vector<8x128xf32>
    %40 = tpu.matmul %37, %39, %cst_27 {dimension_numbers = #tpu.dot_dimension_numbers<[1], [0], [0], [1], [0, 0, 1, 1], [], []>} : vector<8x128xbf16>, vector<128x128xbf16>, vector<8x128xf32> -> vector<8x128xf32>
    %c4_28 = arith.constant 4 : index
    %c0_29 = arith.constant 0 : index
    %c0_30 = arith.constant 0 : index
    %41 = vector.load %arg3[%c4_28, %c0_29, %c0_30] : memref<11x1x128xf32, #tpu.memory_space<vmem>>, vector<1x1x128xf32>
    %42 = vector.shape_cast %41 : vector<1x1x128xf32> to vector<1x128xf32>
    %43 = vector.broadcast %42 : vector<1x128xf32> to vector<8x128xf32>
    %44 = arith.addf %40, %43 : vector<8x128xf32>
    %cst_31 = arith.constant 5.000000e-01 : f32
    %45 = vector.broadcast %cst_31 : f32 to vector<8x128xf32>
    %46 = arith.mulf %45, %44 : vector<8x128xf32>
    %47 = math.exp %46 : vector<8x128xf32>
    %48 = arith.mulf %0, %47 : vector<8x128xf32>
    %49 = arith.truncf %44 : vector<8x128xf32> to vector<8x128xbf16>
    %c5 = arith.constant 5 : index
    %c0_32 = arith.constant 0 : index
    %c0_33 = arith.constant 0 : index
    %50 = vector.load %arg2[%c5, %c0_32, %c0_33] : memref<11x128x128xbf16, #tpu.memory_space<vmem>>, vector<1x128x128xbf16>
    %51 = vector.shape_cast %50 : vector<1x128x128xbf16> to vector<128x128xbf16>
    %cst_34 = arith.constant dense<0.000000e+00> : vector<8x128xf32>
    %52 = tpu.matmul %49, %51, %cst_34 {dimension_numbers = #tpu.dot_dimension_numbers<[1], [0], [0], [1], [0, 0, 1, 1], [], []>} : vector<8x128xbf16>, vector<128x128xbf16>, vector<8x128xf32> -> vector<8x128xf32>
    %53 = arith.truncf %48 : vector<8x128xf32> to vector<8x128xbf16>
    %c6 = arith.constant 6 : index
    %c0_35 = arith.constant 0 : index
    %c0_36 = arith.constant 0 : index
    %54 = vector.load %arg2[%c6, %c0_35, %c0_36] : memref<11x128x128xbf16, #tpu.memory_space<vmem>>, vector<1x128x128xbf16>
    %55 = vector.shape_cast %54 : vector<1x128x128xbf16> to vector<128x128xbf16>
    %cst_37 = arith.constant dense<0.000000e+00> : vector<8x128xf32>
    %56 = tpu.matmul %53, %55, %cst_37 {dimension_numbers = #tpu.dot_dimension_numbers<[1], [0], [0], [1], [0, 0, 1, 1], [], []>} : vector<8x128xbf16>, vector<128x128xbf16>, vector<8x128xf32> -> vector<8x128xf32>
    %57 = arith.addf %52, %56 : vector<8x128xf32>
    %c6_38 = arith.constant 6 : index
    %c0_39 = arith.constant 0 : index
    %c0_40 = arith.constant 0 : index
    %58 = vector.load %arg3[%c6_38, %c0_39, %c0_40] : memref<11x1x128xf32, #tpu.memory_space<vmem>>, vector<1x1x128xf32>
    %59 = vector.shape_cast %58 : vector<1x1x128xf32> to vector<1x128xf32>
    %60 = vector.broadcast %59 : vector<1x128xf32> to vector<8x128xf32>
    %61 = arith.addf %57, %60 : vector<8x128xf32>
    %62 = math.tanh %61 : vector<8x128xf32>
    %63 = arith.truncf %62 : vector<8x128xf32> to vector<8x128xbf16>
    %c0_41 = arith.constant 0 : index
    %c0_42 = arith.constant 0 : index
    %64 = vector.load %arg4[%c0_41, %c0_42] : memref<8x128xf32, #tpu.memory_space<vmem>>, vector<8x128xf32>
    tpu.vector_store %arg4[%c0_41, %c0_42], %44 {strides = array<i32>} : memref<8x128xf32, #tpu.memory_space<vmem>>, vector<8x128xf32>,
    %c7 = arith.constant 7 : index
    %c0_43 = arith.constant 0 : index
    %c0_44 = arith.constant 0 : index
    %65 = vector.load %arg2[%c7, %c0_43, %c0_44] : memref<11x128x128xbf16, #tpu.memory_space<vmem>>, vector<1x128x128xbf16>
    %66 = vector.shape_cast %65 : vector<1x128x128xbf16> to vector<128x128xbf16>
    %cst_45 = arith.constant dense<0.000000e+00> : vector<8x128xf32>
    %67 = tpu.matmul %63, %66, %cst_45 {dimension_numbers = #tpu.dot_dimension_numbers<[1], [0], [0], [1], [0, 0, 1, 1], [], []>} : vector<8x128xbf16>, vector<128x128xbf16>, vector<8x128xf32> -> vector<8x128xf32>
    %c7_46 = arith.constant 7 : index
    %c0_47 = arith.constant 0 : index
    %c0_48 = arith.constant 0 : index
    %68 = vector.load %arg3[%c7_46, %c0_47, %c0_48] : memref<11x1x128xf32, #tpu.memory_space<vmem>>, vector<1x1x128xf32>
    %69 = vector.shape_cast %68 : vector<1x1x128xf32> to vector<1x128xf32>
    %70 = vector.broadcast %69 : vector<1x128xf32> to vector<8x128xf32>
    %71 = arith.addf %67, %70 : vector<8x128xf32>
    %72 = math.tanh %71 : vector<8x128xf32>
    %73 = arith.truncf %72 : vector<8x128xf32> to vector<8x128xbf16>
    %c8 = arith.constant 8 : index
    %c0_49 = arith.constant 0 : index
    %c0_50 = arith.constant 0 : index
    %74 = vector.load %arg2[%c8, %c0_49, %c0_50] : memref<11x128x128xbf16, #tpu.memory_space<vmem>>, vector<1x128x128xbf16>
    %75 = vector.shape_cast %74 : vector<1x128x128xbf16> to vector<128x128xbf16>
    %cst_51 = arith.constant dense<0.000000e+00> : vector<8x128xf32>
    %76 = tpu.matmul %73, %75, %cst_51 {dimension_numbers = #tpu.dot_dimension_numbers<[1], [0], [0], [1], [0, 0, 1, 1], [], []>} : vector<8x128xbf16>, vector<128x128xbf16>, vector<8x128xf32> -> vector<8x128xf32>
    %c8_52 = arith.constant 8 : index
    %c0_53 = arith.constant 0 : index
    %c0_54 = arith.constant 0 : index
    %77 = vector.load %arg3[%c8_52, %c0_53, %c0_54] : memref<11x1x128xf32, #tpu.memory_space<vmem>>, vector<1x1x128xf32>
    %78 = vector.shape_cast %77 : vector<1x1x128xf32> to vector<1x128xf32>
    %79 = vector.broadcast %78 : vector<1x128xf32> to vector<8x128xf32>
    %80 = arith.addf %76, %79 : vector<8x128xf32>
    %81 = math.tanh %80 : vector<8x128xf32>
    %82 = arith.truncf %81 : vector<8x128xf32> to vector<8x128xbf16>
    %c9 = arith.constant 9 : index
    %c0_55 = arith.constant 0 : index
    %c0_56 = arith.constant 0 : index
    %83 = vector.load %arg2[%c9, %c0_55, %c0_56] : memref<11x128x128xbf16, #tpu.memory_space<vmem>>, vector<1x128x128xbf16>
    %84 = vector.shape_cast %83 : vector<1x128x128xbf16> to vector<128x128xbf16>
    %cst_57 = arith.constant dense<0.000000e+00> : vector<8x128xf32>
    %85 = tpu.matmul %82, %84, %cst_57 {dimension_numbers = #tpu.dot_dimension_numbers<[1], [0], [0], [1], [0, 0, 1, 1], [], []>} : vector<8x128xbf16>, vector<128x128xbf16>, vector<8x128xf32> -> vector<8x128xf32>
    %c9_58 = arith.constant 9 : index
    %c0_59 = arith.constant 0 : index
    %c0_60 = arith.constant 0 : index
    %86 = vector.load %arg3[%c9_58, %c0_59, %c0_60] : memref<11x1x128xf32, #tpu.memory_space<vmem>>, vector<1x1x128xf32>
    %87 = vector.shape_cast %86 : vector<1x1x128xf32> to vector<1x128xf32>
    %88 = vector.broadcast %87 : vector<1x128xf32> to vector<8x128xf32>
    %89 = arith.addf %85, %88 : vector<8x128xf32>
    %90 = math.tanh %89 : vector<8x128xf32>
    %91 = arith.truncf %90 : vector<8x128xf32> to vector<8x128xbf16>
    %c10 = arith.constant 10 : index
    %c0_61 = arith.constant 0 : index
    %c0_62 = arith.constant 0 : index
    %92 = vector.load %arg2[%c10, %c0_61, %c0_62] : memref<11x128x128xbf16, #tpu.memory_space<vmem>>, vector<1x128x128xbf16>
    %93 = vector.shape_cast %92 : vector<1x128x128xbf16> to vector<128x128xbf16>
    %cst_63 = arith.constant dense<0.000000e+00> : vector<8x128xf32>
    %94 = tpu.matmul %91, %93, %cst_63 {dimension_numbers = #tpu.dot_dimension_numbers<[1], [0], [0], [1], [0, 0, 1, 1], [], []>} : vector<8x128xbf16>, vector<128x128xbf16>, vector<8x128xf32> -> vector<8x128xf32>
    %c10_64 = arith.constant 10 : index
    %c0_65 = arith.constant 0 : index
    %c0_66 = arith.constant 0 : index
    %95 = vector.load %arg3[%c10_64, %c0_65, %c0_66] : memref<11x1x128xf32, #tpu.memory_space<vmem>>, vector<1x1x128xf32>
    %96 = vector.shape_cast %95 : vector<1x1x128xf32> to vector<1x128xf32>
    %97 = vector.broadcast %96 : vector<1x128xf32> to vector<8x128xf32>
    %98 = arith.addf %94, %97 : vector<8x128xf32>
    %c0_67 = arith.constant 0 : index
    %c0_68 = arith.constant 0 : index
    %99 = vector.load %arg4[%c0_67, %c0_68] : memref<8x128xf32, #tpu.memory_space<vmem>>, vector<8x128xf32>
    %100 = arith.addf %99, %98 : vector<8x128xf32>
    %c0_69 = arith.constant 0 : index
    %c0_70 = arith.constant 0 : index
    %101 = vector.load %arg4[%c0_69, %c0_70] : memref<8x128xf32, #tpu.memory_space<vmem>>, vector<8x128xf32>
    tpu.vector_store %arg4[%c0_69, %c0_70], %100 {strides = array<i32>} : memref<8x128xf32, #tpu.memory_space<vmem>>, vector<8x128xf32>,
    return
  }
  func.func @transform_0(%arg0: i32) -> (i32, i32) {
    %c0_i32 = arith.constant 0 : i32
    %c0_i32_0 = arith.constant 0 : i32
    return %arg0, %c0_i32 : i32, i32
  }
  func.func @transform_1(%arg0: i32) -> (i32, i32, i32) {
    %c0_i32 = arith.constant 0 : i32
    %c0_i32_0 = arith.constant 0 : i32
    %c0_i32_1 = arith.constant 0 : i32
    %c0_i32_2 = arith.constant 0 : i32
    return %c0_i32, %c0_i32_0, %c0_i32_1 : i32, i32, i32
  }
  func.func @transform_2(%arg0: i32) -> (i32, i32, i32) {
    %c0_i32 = arith.constant 0 : i32
    %c0_i32_0 = arith.constant 0 : i32
    %c0_i32_1 = arith.constant 0 : i32
    %c0_i32_2 = arith.constant 0 : i32
    return %c0_i32, %c0_i32_0, %c0_i32_1 : i32, i32, i32
  }
  func.func @transform_3(%arg0: i32) -> (i32, i32) {
    %c0_i32 = arith.constant 0 : i32
    %c0_i32_0 = arith.constant 0 : i32
    return %arg0, %c0_i32 : i32, i32
  }
}

</mosaic_0001>

<bundles_post_ra>
// kernel: tpu_custom_call.1
= control target key start
LH: loop header
LB: loop body
LE: loop exit
PB: predicated region body
PF: predicated region fallthrough
CT: control target
= control target key end

     0   :  { %8 = vsyncpa [#allocation3], 0  ;;  %s2115_s0 = inlined_call_operand.hbm [shape: f32[8,128], index: 0, kind: input, shape index: {}]   ;;  %s2116_s1 = inlined_call_operand.hbm [shape: bf16[11,128,128], index: 1, kind: input, shape index: {}]   ;;  %s2117_s2 = inlined_call_operand.hbm [shape: f32[11,1,128], index: 2, kind: input, shape index: {}]   ;;  %s2118_s3 = inlined_call_operand.hbm [shape: f32[8,128], index: 3, kind: output, shape index: {}]  }
   0x1   :  { %9 = vsyncpa [#allocation6], 0 }
   0x2   :  { %10 = vsyncpa [#allocation4], 0  ;;  %s1952_s12 = smov [#allocation5]  }
   0x3   :  { %s26_s13 = sshll.u32 %s1952_s12, 4  ;;  %s27_s13 = int_to_ptr.vmem [resolvable:$true] %s26_s13 }
   0x4   :  { %s1874_s14 = scalar_lea.vmem %s27_s13, 11264  ;;  %p1879_p1 = scmp.lt.s32.totalorder %s27_s13, %s27_s13 }
   0x5   :  { %p1875_p0 = scmp.ne.s32.totalorder %s27_s13, %s1874_s14  ;;  %p1880_p2 = scmp.lt.s32.totalorder %s1874_s14, %s1874_s14 }
   0x7   :  { %p1881_p3 = por %p1880_p2, %p1879_p1 }
   0x9   :  { %p1882_p4 = pnand %p1881_p3, %p1875_p0 }
   0xb   :  { %1885 = shalt.err (!%p1882_p4)
}
   0xc   :  { %s1953_s15 = smov 64   ;;  %s1954_s16 = smov 4  }
   0xd   :  { %32 = dma.hbm_to_vmem [thread:$0]  %s2116_s1, 11264, %s27_s13, [#allocation6], %s1953_s15, %s1953_s15, %s1954_s16  }
   0xe   :  { %s1955_s19 = smov [#allocation2]   ;;  %s1956_s21 = smov [#allocation7]  }
   0xf   :  { %s17_s20 = sshll.u32 %s1955_s19, 4  ;;  %s38_s22 = sshll.u32 %s1956_s21, 4  ;;  %s18_s20 = int_to_ptr.vmem [resolvable:$true] %s17_s20  ;;  %s39_s22 = int_to_ptr.vmem [resolvable:$true] %s38_s22 }
  0x10   :  { %s1894_s23 = scalar_lea.vmem %s18_s20, 128  ;;  %p1899_p6 = scmp.lt.s32.totalorder %s18_s20, %s18_s20 }
  0x11   :  { %p1895_p5 = scmp.ne.s32.totalorder %s18_s20, %s1894_s23  ;;  %p1900_p7 = scmp.lt.s32.totalorder %s1894_s23, %s1894_s23 }
  0x13   :  { %p1901_p8 = por %p1900_p7, %p1899_p6 }
  0x15   :  { %p1902_p9 = pnand %p1901_p8, %p1895_p5 }
  0x17   :  { %1905 = shalt.err (!%p1902_p9)
}
  0x18   :  { %20 = dma.hbm_to_vmem [thread:$0]  %s2115_s0, 128, %s18_s20, [#allocation3]  }
  0x19   :  { %s1914_s26 = scalar_lea.vmem %s39_s22, 176  ;;  %s1918_s1 = scalar_lea.vmem %s39_s22, 192 }
  0x1a   :  { %p1915_p10 = scmp.ne.s32.totalorder %s39_s22, %s1914_s26  ;;  %p1919_p11 = scmp.lt.s32.totalorder %s39_s22, %s39_s22 }
  0x1b   :  { %p1920_p12 = scmp.lt.s32.totalorder %s1918_s1, %s1914_s26 }
  0x1d   :  { %p1921_p13 = por %p1920_p12, %p1919_p11 }
  0x1f   :  { %p1922_p0 = pnand %p1921_p13, %p1915_p10 }
  0x21   :  { %1925 = shalt.err (!%p1922_p0)
}
  0x22   :  { %s1957_s27 = smov 16   ;;  %s1958_s28 = smov 1  }
  0x23   :  { %44 = dma.hbm_to_vmem [thread:$0]  %s2117_s2, 176, %s39_s22, [#allocation6], %s1957_s27, %s1957_s27, %s1958_s28  }
  0x24   :  { %1946 = dma.done.wait [#allocation3], 128  }
  0x25   :  { %1947 = vsyncadd [#allocation3], 4294967168 }
  0x26   :  { %1948 = dma.done.wait [#allocation6], 11440  }
  0x27   :  { %1949 = vsyncadd [#allocation6], 4294955856  ;;  %v1959_v0 = vmov 0.0   ;;  %vm1960_vm0 = vmmov 0   ;;  %v1760_v1 = vld [vmem:[#allocation5 + $0x38] sm:$0xff]   ;;  %v1761_v2 = vld [vmem:[#allocation5 + $0x30] sm:$0xff]  }
  0x28   :  { %1530 = vmatprep.subr.bf16.mxu0 %v1959_v0  ;;  %1546 = vmatprep.mubr.msk.bf16.mxu0 %vm1960_vm0, %v1959_v0  ;;  %v1762_v3 = vld [vmem:[#allocation5 + $0x28] sm:$0xff]   ;;  %v1768_v4 = vld [vmem:[#allocation5 + $0x78] sm:$0xff]   ;;  %v1763_v5 = vld [vmem:[#allocation5 + $0x20] sm:$0xff]   ;;  %s1961_s0 = smov [#allocation8]  }
  0x29   :  { %1550 = vmatprep.subr.bf16.mxu1 %v1959_v0  ;;  %1566 = vmatprep.mubr.msk.bf16.mxu1 %vm1960_vm0, %v1959_v0  ;;  %v1769_v6 = vld [vmem:[#allocation5 + $0x70] sm:$0xff]   ;;  %v1764_v7 = vld [vmem:[#allocation5 + $0x18] sm:$0xff]   ;;  %v1770_v8 = vld [vmem:[#allocation5 + $0x68] sm:$0xff]   ;;  %s1323_s2 = sshll.u32 %s1961_s0, 4  ;;  %s1324_s2 = int_to_ptr.vmem [resolvable:$true] %s1323_s2 }
  0x2a   :  { %1531 = vmatpush3.bf16.msra.mxu0 %v1760_v1  ;;  %1551 = vmatpush3.bf16.msra.mxu1 %v1768_v4  ;;  %v1765_v9 = vld [vmem:[#allocation5 + $0x10] sm:$0xff]   ;;  %v1766_v10 = vld [vmem:[#allocation5 + $0x8] sm:$0xff]   ;;  %v1767_v11 = vld [vmem:[#allocation5] sm:$0xff]   ;;  %s1926_s4 = scalar_lea.vmem %s1324_s2, 128  ;;  %p1931_p2 = scmp.lt.s32.totalorder %s1324_s2, %s1324_s2 }
  0x2b   :  { %1532 = vmatprep.subr.bf16.mxu0 %v1959_v0  ;;  %1552 = vmatprep.subr.bf16.mxu1 %v1959_v0  ;;  %v2006_v12 = vld [vmem:[#allocation2] sm:$0xff]  ;;  %v1771_v14 = vld [vmem:[#allocation5 + $0x60] sm:$0xff]   ;;  %v1773_v16 = vld [vmem:[#allocation5 + $0x50] sm:$0xff]   ;;  %p1927_p1 = scmp.ne.s32.totalorder %s1324_s2, %s1926_s4  ;;  %p1932_p3 = scmp.lt.s32.totalorder %s1926_s4, %s1926_s4 }
  0x2c   :  { %v56_v13 = vpack.c.bf16 %v2006_v12, %v2006_v12  ;;  %v1772_v15 = vld [vmem:[#allocation5 + $0x58] sm:$0xff]   ;;  %v1774_v17 = vld [vmem:[#allocation5 + $0x48] sm:$0xff]   ;;  %v1775_v18 = vld [vmem:[#allocation5 + $0x40] sm:$0xff]  }
  0x2d   :  { %v1776_v19 = vld [vmem:[#allocation5 + $0xb8] sm:$0xff]   ;;  %v1777_v20 = vld [vmem:[#allocation5 + $0xb0] sm:$0xff]   ;;  %v1778_v21 = vld [vmem:[#allocation5 + $0xa8] sm:$0xff]   ;;  %p1933_p4 = por %p1932_p3, %p1931_p2 }
  0x2e   :  { %1533 = vmatpush3.bf16.msra.mxu0 %v1761_v2  ;;  %1553 = vmatpush3.bf16.msra.mxu1 %v1769_v6  ;;  %v1333_v22 = vld [vmem:[#allocation7] ss:$0 sm:$0xff]  ;;  %v1780_v31 = vld [vmem:[#allocation5 + $0x98] sm:$0xff]   ;;  %v1781_v32 = vld [vmem:[#allocation5 + $0x90] sm:$0xff]  }
  0x2f   :  { %1534 = vmatprep.subr.bf16.mxu0 %v1959_v0  ;;  %1554 = vmatprep.subr.bf16.mxu1 %v1959_v0  ;;  %v1779_v30 = vld [vmem:[#allocation5 + $0xa0] sm:$0xff]   ;;  %v1782_v33 = vld [vmem:[#allocation5 + $0x88] sm:$0xff]   ;;  %v1784_v35 = vld [vmem:[#allocation5 + $0xf8] sm:$0xff]   ;;  %p1934_p5 = pnand %p1933_p4, %p1927_p1 }
  0x30   :  { %v1783_v34 = vld [vmem:[#allocation5 + $0x80] sm:$0xff]   ;;  %v1785_v36 = vld [vmem:[#allocation5 + $0xf0] sm:$0xff]   ;;  %v1786_v37 = vld [vmem:[#allocation5 + $0xe8] sm:$0xff]  }
  0x31   :  { %v1342_v38 = vld [vmem:[#allocation7 + $0x1] ss:$0 sm:$0xff]  ;;  %v1788_v47 = vld [vmem:[#allocation5 + $0xd8] sm:$0xff]   ;;  %v1789_v48 = vld [vmem:[#allocation5 + $0xd0] sm:$0xff]  }
  0x32   :  { %1535 = vmatpush3.bf16.msra.mxu0 %v1762_v3  ;;  %1555 = vmatpush3.bf16.msra.mxu1 %v1770_v8  ;;  %v1787_v46 = vld [vmem:[#allocation5 + $0xe0] sm:$0xff]   ;;  %v1790_v49 = vld [vmem:[#allocation5 + $0xc8] sm:$0xff]   ;;  %v1792_v51 = vld [vmem:[#allocation5 + $0x138] sm:$0xff]  }
  0x33   :  { %1536 = vmatprep.subr.bf16.mxu0 %v1959_v0  ;;  %1556 = vmatprep.subr.bf16.mxu1 %v1959_v0  ;;  %v1791_v50 = vld [vmem:[#allocation5 + $0xc0] sm:$0xff]   ;;  %v1793_v52 = vld [vmem:[#allocation5 + $0x130] sm:$0xff]   ;;  %v1794_v53 = vld [vmem:[#allocation5 + $0x128] sm:$0xff]  }
  0x34   :  { %v1351_v54 = vld [vmem:[#allocation7 + $0x2] ss:$0 sm:$0xff]  ;;  %v1796_v63 = vld [vmem:[#allocation5 + $0x118] sm:$0xff]   ;;  %v1797_v1 = vld [vmem:[#allocation5 + $0x110] sm:$0xff]  }
  0x35   :  { %v1795_v62 = vld [vmem:[#allocation5 + $0x120] sm:$0xff]   ;;  %v1798_v2 = vld [vmem:[#allocation5 + $0x108] sm:$0xff]   ;;  %v1805_v4 = vld [vmem:[#allocation5 + $0x1b8] sm:$0xff]  }
  0x36   :  { %1537 = vmatpush3.bf16.msra.mxu0 %v1763_v5  ;;  %1557 = vmatpush3.bf16.msra.mxu1 %v1771_v14  ;;  %v1799_v3 = vld [vmem:[#allocation5 + $0x100] sm:$0xff]   ;;  %v1807_v5 = vld [vmem:[#allocation5 + $0x1b0] sm:$0xff]   ;;  %v1800_v14 = vld [vmem:[#allocation5 + $0x178] sm:$0xff]  }
  0x37   :  { %1538 = vmatprep.subr.bf16.mxu0 %v1959_v0  ;;  %1558 = vmatprep.subr.bf16.mxu1 %v1959_v0  ;;  %v1360_v6 = vld [vmem:[#allocation7 + $0x3] ss:$0 sm:$0xff] }
  0x3a   :  { %1539 = vmatpush3.bf16.msra.mxu0 %v1764_v7  ;;  %1559 = vmatpush3.bf16.msra.mxu1 %v1772_v15 }
  0x3b   :  { %1540 = vmatprep.subr.bf16.mxu0 %v1959_v0  ;;  %1560 = vmatprep.subr.bf16.mxu1 %v1959_v0 }
  0x3e   :  { %1541 = vmatpush3.bf16.msra.mxu0 %v1765_v9  ;;  %1561 = vmatpush3.bf16.msra.mxu1 %v1773_v16  ;;  %v1801_v16 = vld [vmem:[#allocation5 + $0x170] sm:$0xff]  }
  0x3f   :  { %1542 = vmatprep.subr.bf16.mxu0 %v1959_v0  ;;  %1562 = vmatprep.subr.bf16.mxu1 %v1959_v0 }
  0x42   :  { %1543 = vmatpush3.bf16.msra.mxu0 %v1766_v10  ;;  %1563 = vmatpush3.bf16.msra.mxu1 %v1774_v17  ;;  %v1802_v17 = vld [vmem:[#allocation5 + $0x168] sm:$0xff]  }
  0x43   :  { %1544 = vmatprep.subr.bf16.mxu0 %v1959_v0  ;;  %1564 = vmatprep.subr.bf16.mxu1 %v1959_v0 }
  0x46   :  { %1545 = vmatpush3.bf16.msra.mxu0 %v1767_v11  ;;  %1565 = vmatpush3.bf16.msra.mxu1 %v1775_v18  ;;  %v1803_v18 = vld [vmem:[#allocation5 + $0x160] sm:$0xff]  }
  0x47   :  { %1570 = vmatprep.subr.bf16.mxu0 %v1959_v0  ;;  %1590 = vmatprep.subr.bf16.mxu1 %v1959_v0 }
  0x49   :  { %1547 = vmatmul.mubr.bf16.vlgmr.msra.gmra.mxu0 %v56_v13 }
  0x4a   :  { %1586 = vmatprep.mubr.msk.bf16.mxu0 %vm1960_vm0, %v1959_v0  ;;  %1571 = vmatpush3.bf16.msra.mxu0 %v1776_v19  ;;  %v1804_v19 = vld [vmem:[#allocation5 + $0x158] sm:$0xff]  }
  0x4b   :  { %1572 = vmatprep.subr.bf16.mxu0 %v1959_v0 }
  0x4e   :  { %1573 = vmatpush3.bf16.msra.mxu0 %v1777_v20  ;;  %v1806_v20 = vld [vmem:[#allocation5 + $0x150] sm:$0xff]  }
  0x4f   :  { %1574 = vmatprep.subr.bf16.mxu0 %v1959_v0 }
  0x52   :  { %1575 = vmatpush3.bf16.msra.mxu0 %v1778_v21  ;;  %v1808_v21 = vld [vmem:[#allocation5 + $0x148] sm:$0xff]  }
  0x53   :  { %1576 = vmatprep.subr.bf16.mxu0 %v1959_v0 }
  0x56   :  { %1577 = vmatpush3.bf16.msra.mxu0 %v1779_v30 }
  0x57   :  { %1578 = vmatprep.subr.bf16.mxu0 %v1959_v0 }
  0x5a   :  { %1579 = vmatpush3.bf16.msra.mxu0 %v1780_v31 }
  0x5b   :  { %1580 = vmatprep.subr.bf16.mxu0 %v1959_v0 }
  0x5e   :  { %1581 = vmatpush3.bf16.msra.mxu0 %v1781_v32 }
  0x5f   :  { %1582 = vmatprep.subr.bf16.mxu0 %v1959_v0 }
  0x62   :  { %1583 = vmatpush3.bf16.msra.mxu0 %v1782_v33 }
  0x63   :  { %1584 = vmatprep.subr.bf16.mxu0 %v1959_v0 }
  0x66   :  { %1585 = vmatpush3.bf16.msra.mxu0 %v1783_v34 }
  0x67   :  { %1610 = vmatprep.subr.bf16.mxu0 %v1959_v0 }
 0x109   :  { %v162_v23 = vpop.f32.mrf.mxu0 }
 0x10a   :  { %v163_v24 = vadd.f32 %v1333_v22, %v162_v23  ;;  %v1809_v22 = vld [vmem:[#allocation5 + $0x1a8] sm:$0xff]   ;;  %v1810_v23 = vld [vmem:[#allocation5 + $0x140] sm:$0xff]  }
 0x10b   :  { %v1548_v25 = vpop.f32.mrf.mxu0 }
 0x10c   :  { %1848 = vtanh.f32 %v163_v24  ;;  %v1811_v24 = vld [vmem:[#allocation5 + $0x1a0] sm:$0xff]   ;;  %v1812_v25 = vld [vmem:[#allocation5 + $0x198] sm:$0xff]  }
 0x10d   :  { %v165_v26 = vpop.f32.mrf.mxu0 }
 0x10e   :  { %v1813_v26 = vld [vmem:[#allocation5 + $0x190] sm:$0xff]  }
 0x10f   :  { %v1549_v27 = vpop.f32.mrf.mxu0 }
 0x110   :  { %v1814_v27 = vld [vmem:[#allocation5 + $0x188] sm:$0xff]  }
 0x119   :  { %v1849_v28 = vpop.eup %1848 }
 0x11a   :  { %v169_v29 = vpack.c.bf16 %v1849_v28, %v1849_v28  ;;  %v1815_v28 = vld [vmem:[#allocation5 + $0x180] sm:$0xff]  }
 0x11c   :  { %1567 = vmatmul.mubr.bf16.vlgmr.msra.gmra.mxu1 %v169_v29  ;;  %v1369_v29 = vld [vmem:[#allocation7 + $0x4] ss:$0 sm:$0xff] }
 0x11d   :  { %1606 = vmatprep.mubr.msk.bf16.mxu1 %vm1960_vm0, %v1959_v0  ;;  %1591 = vmatpush3.bf16.msra.mxu1 %v1784_v35 }
 0x11e   :  { %1592 = vmatprep.subr.bf16.mxu1 %v1959_v0 }
 0x121   :  { %1593 = vmatpush3.bf16.msra.mxu1 %v1785_v36 }
 0x122   :  { %1594 = vmatprep.subr.bf16.mxu1 %v1959_v0 }
 0x125   :  { %1595 = vmatpush3.bf16.msra.mxu1 %v1786_v37 }
 0x126   :  { %1596 = vmatprep.subr.bf16.mxu1 %v1959_v0 }
 0x129   :  { %1597 = vmatpush3.bf16.msra.mxu1 %v1787_v46  ;;  %v1822_v46 = vld [vmem:[#allocation5 + $0x1c8] sm:$0xff]  }
 0x12a   :  { %1598 = vmatprep.subr.bf16.mxu1 %v1959_v0 }
 0x12d   :  { %1599 = vmatpush3.bf16.msra.mxu1 %v1788_v47  ;;  %v1823_v47 = vld [vmem:[#allocation5 + $0x1c0] sm:$0xff]  }
 0x12e   :  { %1600 = vmatprep.subr.bf16.mxu1 %v1959_v0 }
 0x131   :  { %1601 = vmatpush3.bf16.msra.mxu1 %v1789_v48  ;;  %v1824_v48 = vld [vmem:[#allocation5 + $0x238] sm:$0xff]  }
 0x132   :  { %1602 = vmatprep.subr.bf16.mxu1 %v1959_v0 }
 0x135   :  { %1603 = vmatpush3.bf16.msra.mxu1 %v1790_v49  ;;  %v1825_v49 = vld [vmem:[#allocation5 + $0x230] sm:$0xff]  }
 0x136   :  { %1604 = vmatprep.subr.bf16.mxu1 %v1959_v0 }
 0x139   :  { %1605 = vmatpush3.bf16.msra.mxu1 %v1791_v50  ;;  %v1826_v50 = vld [vmem:[#allocation5 + $0x228] sm:$0xff]  }
 0x13a   :  { %1630 = vmatprep.subr.bf16.mxu1 %v1959_v0 }
 0x1dc   :  { %v277_v39 = vpop.f32.mrf.mxu1 }
 0x1dd   :  { %v278_v40 = vadd.f32 %v1342_v38, %v277_v39 }
 0x1de   :  { %v1568_v41 = vpop.f32.mrf.mxu1 }
 0x1df   :  { %1850 = vtanh.f32 %v278_v40  ;;  %v1816_v41 = vld [vmem:[#allocation5 + $0x1f8] sm:$0xff]  }
 0x1e0   :  { %v280_v42 = vpop.f32.mrf.mxu1 }
 0x1e1   :  { %v1817_v42 = vld [vmem:[#allocation5 + $0x1f0] sm:$0xff]  }
 0x1e2   :  { %v1569_v43 = vpop.f32.mrf.mxu1 }
 0x1e3   :  { %v1818_v43 = vld [vmem:[#allocation5 + $0x1e8] sm:$0xff]  }
 0x1ec   :  { %v1851_v44 = vpop.eup %1850 }
 0x1ed   :  { %v284_v45 = vpack.c.bf16 %v1851_v44, %v1851_v44  ;;  %v1819_v44 = vld [vmem:[#allocation5 + $0x1e0] sm:$0xff]  }
 0x1ef   :  { %1587 = vmatmul.mubr.bf16.vlgmr.msra.gmra.mxu0 %v284_v45  ;;  %v1821_v45 = vld [vmem:[#allocation5 + $0x1d0] sm:$0xff]  }
 0x1f0   :  { %1626 = vmatprep.mubr.msk.bf16.mxu0 %vm1960_vm0, %v1959_v0  ;;  %1611 = vmatpush3.bf16.msra.mxu0 %v1792_v51 }
 0x1f1   :  { %1612 = vmatprep.subr.bf16.mxu0 %v1959_v0 }
 0x1f4   :  { %1613 = vmatpush3.bf16.msra.mxu0 %v1793_v52 }
 0x1f5   :  { %1614 = vmatprep.subr.bf16.mxu0 %v1959_v0 }
 0x1f8   :  { %1615 = vmatpush3.bf16.msra.mxu0 %v1794_v53 }
 0x1f9   :  { %1616 = vmatprep.subr.bf16.mxu0 %v1959_v0 }
 0x1fc   :  { %1617 = vmatpush3.bf16.msra.mxu0 %v1795_v62 }
 0x1fd   :  { %1618 = vmatprep.subr.bf16.mxu0 %v1959_v0 }
 0x200   :  { %1619 = vmatpush3.bf16.msra.mxu0 %v1796_v63 }
 0x201   :  { %1620 = vmatprep.subr.bf16.mxu0 %v1959_v0 }
 0x204   :  { %1621 = vmatpush3.bf16.msra.mxu0 %v1797_v1  ;;  %v1827_v1 = vld [vmem:[#allocation5 + $0x220] sm:$0xff]  }
 0x205   :  { %1622 = vmatprep.subr.bf16.mxu0 %v1959_v0 }
 0x208   :  { %1623 = vmatpush3.bf16.msra.mxu0 %v1798_v2  ;;  %v1828_v2 = vld [vmem:[#allocation5 + $0x218] sm:$0xff]  }
 0x209   :  { %1624 = vmatprep.subr.bf16.mxu0 %v1959_v0 }
 0x20c   :  { %1625 = vmatpush3.bf16.msra.mxu0 %v1799_v3  ;;  %v1829_v3 = vld [vmem:[#allocation5 + $0x210] sm:$0xff]  }
 0x20d   :  { %1650 = vmatprep.subr.bf16.mxu0 %v1959_v0 }
 0x2af   :  { %v392_v55 = vpop.f32.mrf.mxu0 }
 0x2b0   :  { %v393_v56 = vadd.f32 %v1351_v54, %v392_v55 }
 0x2b1   :  { %v1588_v57 = vpop.f32.mrf.mxu0 }
 0x2b2   :  { %1852 = vtanh.f32 %v393_v56  ;;  %v1394_v56 = vld [vmem:[#allocation7 + $0x6] ss:$0 sm:$0xff] }
 0x2b3   :  { %v395_v58 = vpop.f32.mrf.mxu0 }
 0x2b5   :  { %v1589_v59 = vpop.f32.mrf.mxu0 }
 0x2bf   :  { %v1853_v60 = vpop.eup %1852 }
 0x2c0   :  { %v399_v61 = vpack.c.bf16 %v1853_v60, %v1853_v60 }
 0x2c2   :  { %1607 = vmatmul.mubr.bf16.vlgmr.msra.gmra.mxu1 %v399_v61 }
 0x2c3   :  { %1646 = vmatprep.mubr.msk.bf16.mxu1 %vm1960_vm0, %v1959_v0  ;;  %1631 = vmatpush3.bf16.msra.mxu1 %v1805_v4  ;;  %v1830_v4 = vld [vmem:[#allocation5 + $0x208] sm:$0xff]  }
 0x2c4   :  { %1632 = vmatprep.subr.bf16.mxu1 %v1959_v0 }
 0x2c7   :  { %1633 = vmatpush3.bf16.msra.mxu1 %v1807_v5  ;;  %v1831_v5 = vld [vmem:[#allocation5 + $0x200] sm:$0xff]  }
 0x2c8   :  { %1634 = vmatprep.subr.bf16.mxu1 %v1959_v0 }
 0x2cb   :  { %1635 = vmatpush3.bf16.msra.mxu1 %v1809_v22  ;;  %v1839_v22 = vld [vmem:[#allocation5 + $0x240] sm:$0xff]  }
 0x2cc   :  { %1636 = vmatprep.subr.bf16.mxu1 %v1959_v0 }
 0x2cf   :  { %1637 = vmatpush3.bf16.msra.mxu1 %v1811_v24  ;;  %v1841_v24 = vld [vmem:[#allocation5 + $0x2b0] sm:$0xff]  }
 0x2d0   :  { %1638 = vmatprep.subr.bf16.mxu1 %v1959_v0 }
 0x2d3   :  { %1639 = vmatpush3.bf16.msra.mxu1 %v1812_v25  ;;  %v1842_v25 = vld [vmem:[#allocation5 + $0x2a8] sm:$0xff]  }
 0x2d4   :  { %1640 = vmatprep.subr.bf16.mxu1 %v1959_v0 }
 0x2d7   :  { %1641 = vmatpush3.bf16.msra.mxu1 %v1813_v26  ;;  %v1404_v26 = vld [vmem:[#allocation7 + $0x8] ss:$0 sm:$0xff] }
 0x2d8   :  { %1642 = vmatprep.subr.bf16.mxu1 %v1959_v0 }
 0x2db   :  { %1643 = vmatpush3.bf16.msra.mxu1 %v1814_v27 }
 0x2dc   :  { %1644 = vmatprep.subr.bf16.mxu1 %v1959_v0 }
 0x2df   :  { %1645 = vmatpush3.bf16.msra.mxu1 %v1815_v28 }
 0x2e0   :  { %1670 = vmatprep.subr.bf16.mxu1 %v1959_v0 }
 0x382   :  { %v507_v7 = vpop.f32.mrf.mxu1 }
 0x383   :  { %v508_v8 = vadd.f32 %v1360_v6, %v507_v7  ;;  %v1832_v6 = vld [vmem:[#allocation5 + $0x278] sm:$0xff]   ;;  %v1833_v7 = vld [vmem:[#allocation5 + $0x270] sm:$0xff]  }
 0x384   :  { %v1608_v9 = vpop.f32.mrf.mxu1 }
 0x385   :  { %1854 = vtanh.f32 %v508_v8  ;;  %v1834_v8 = vld [vmem:[#allocation5 + $0x268] sm:$0xff]   ;;  %v1395_v9 = vld [vmem:[#allocation7 + $0x7] ss:$0 sm:$0xff] }
 0x386   :  { %v510_v10 = vpop.f32.mrf.mxu1 }
 0x388   :  { %v1609_v11 = vpop.f32.mrf.mxu1 }
 0x392   :  { %v1855_v13 = vpop.eup %1854 }
 0x393   :  { %v514_v15 = vpack.c.bf16 %v1855_v13, %v1855_v13 }
 0x395   :  { %1627 = vmatmul.mubr.bf16.vlgmr.msra.gmra.mxu0 %v514_v15 }
 0x396   :  { %1651 = vmatpush3.bf16.msra.mxu0 %v1800_v14  ;;  %1666 = vmatprep.mubr.msk.bf16.mxu0 %vm1960_vm0, %v1959_v0 }
 0x397   :  { %1652 = vmatprep.subr.bf16.mxu0 %v1959_v0 }
 0x39a   :  { %1653 = vmatpush3.bf16.msra.mxu0 %v1801_v16 }
 0x39b   :  { %1654 = vmatprep.subr.bf16.mxu0 %v1959_v0 }
 0x39e   :  { %1655 = vmatpush3.bf16.msra.mxu0 %v1802_v17 }
 0x39f   :  { %1656 = vmatprep.subr.bf16.mxu0 %v1959_v0 }
 0x3a2   :  { %1657 = vmatpush3.bf16.msra.mxu0 %v1803_v18  ;;  %v1835_v18 = vld [vmem:[#allocation5 + $0x260] sm:$0xff]  }
 0x3a3   :  { %1658 = vmatprep.subr.bf16.mxu0 %v1959_v0 }
 0x3a6   :  { %1659 = vmatpush3.bf16.msra.mxu0 %v1804_v19  ;;  %v1836_v19 = vld [vmem:[#allocation5 + $0x258] sm:$0xff]  }
 0x3a7   :  { %1660 = vmatprep.subr.bf16.mxu0 %v1959_v0 }
 0x3aa   :  { %1661 = vmatpush3.bf16.msra.mxu0 %v1806_v20  ;;  %v1837_v20 = vld [vmem:[#allocation5 + $0x250] sm:$0xff]  }
 0x3ab   :  { %1662 = vmatprep.subr.bf16.mxu0 %v1959_v0 }
 0x3ae   :  { %1663 = vmatpush3.bf16.msra.mxu0 %v1808_v21  ;;  %v1838_v21 = vld [vmem:[#allocation5 + $0x248] sm:$0xff]  }
 0x3af   :  { %1664 = vmatprep.subr.bf16.mxu0 %v1959_v0 }
 0x3b2   :  { %1665 = vmatpush3.bf16.msra.mxu0 %v1810_v23  ;;  %v1840_v23 = vld [vmem:[#allocation5 + $0x2b8] sm:$0xff]  }
 0x3b3   :  { %1690 = vmatprep.subr.bf16.mxu0 %v1959_v0 }
 0x455   :  { %v622_v30 = vpop.f32.mrf.mxu0 }
 0x456   :  { %v2067_v31 = vadd.f32 %v1369_v29, %v622_v30 }
 0x457   :  { %v1628_v32 = vpop.f32.mrf.mxu0 }
 0x458   :  { %v628_v33 = vmul.f32 0.5, %v2067_v31  ;;  %v632_v34 = vpack.c.bf16 %v2067_v31, %v2067_v31 }
 0x459   :  { %v625_v35 = vpop.f32.mrf.mxu0 }
 0x45a   :  { %v629_v36 = vmul.f32 1.442695, %v628_v33  ;;  %1667 = vmatmul.mubr.bf16.vlgmr.msra.gmra.mxu0 %v632_v34  ;;  %v1843_v35 = vld [vmem:[#allocation5 + $0x2a0] sm:$0xff]  }
 0x45b   :  { %v1629_v37 = vpop.f32.mrf.mxu0  ;;  %1706 = vmatprep.mubr.msk.bf16.mxu0 %vm1960_vm0, %v1959_v0  ;;  %1691 = vmatpush3.bf16.msra.mxu0 %v1824_v48 }
 0x45c   :  { %1856 = vpow2.f32 %v629_v36  ;;  %1692 = vmatprep.subr.bf16.mxu0 %v1959_v0  ;;  %v1844_v36 = vld [vmem:[#allocation5 + $0x298] sm:$0xff]   ;;  %v1845_v37 = vld [vmem:[#allocation5 + $0x290] sm:$0xff]  }
 0x45f   :  { %1693 = vmatpush3.bf16.msra.mxu0 %v1825_v49 }
 0x460   :  { %1694 = vmatprep.subr.bf16.mxu0 %v1959_v0 }
 0x463   :  { %1695 = vmatpush3.bf16.msra.mxu0 %v1826_v50 }
 0x464   :  { %1696 = vmatprep.subr.bf16.mxu0 %v1959_v0 }
 0x467   :  { %1697 = vmatpush3.bf16.msra.mxu0 %v1827_v1 }
 0x468   :  { %1698 = vmatprep.subr.bf16.mxu0 %v1959_v0 }
 0x469   :  { %v1857_v38 = vpop.eup %1856 }
 0x46a   :  { %v631_v39 = vmul.f32 %v1857_v38, %v2006_v12  ;;  %v1820_v12 = vld [vmem:[#allocation5 + $0x1d8] sm:$0xff]   ;;  %v1846_v38 = vld [vmem:[#allocation5 + $0x288] sm:$0xff]  }
 0x46b   :  { %1699 = vmatpush3.bf16.msra.mxu0 %v1828_v2 }
 0x46c   :  { %v650_v40 = vpack.c.bf16 %v631_v39, %v631_v39  ;;  %1700 = vmatprep.subr.bf16.mxu0 %v1959_v0  ;;  %v1847_v39 = vld [vmem:[#allocation5 + $0x280] sm:$0xff]  }
 0x46e   :  { %1647 = vmatmul.mubr.bf16.vlgmr.msra.gmra.mxu1 %v650_v40  ;;  %v1413_v40 = vld [vmem:[#allocation7 + $0x9] ss:$0 sm:$0xff] }
 0x46f   :  { %1686 = vmatprep.mubr.msk.bf16.mxu1 %vm1960_vm0, %v1959_v0  ;;  %1671 = vmatpush3.bf16.msra.mxu1 %v1816_v41 }
 0x470   :  { %1672 = vmatprep.subr.bf16.mxu1 %v1959_v0  ;;  %1701 = vmatpush3.bf16.msra.mxu0 %v1829_v3 }
 0x471   :  { %1702 = vmatprep.subr.bf16.mxu0 %v1959_v0 }
 0x473   :  { %1673 = vmatpush3.bf16.msra.mxu1 %v1817_v42 }
 0x474   :  { %1674 = vmatprep.subr.bf16.mxu1 %v1959_v0  ;;  %1703 = vmatpush3.bf16.msra.mxu0 %v1830_v4 }
 0x475   :  { %1704 = vmatprep.subr.bf16.mxu0 %v1959_v0 }
 0x477   :  { %1675 = vmatpush3.bf16.msra.mxu1 %v1818_v43 }
 0x478   :  { %1676 = vmatprep.subr.bf16.mxu1 %v1959_v0  ;;  %1705 = vmatpush3.bf16.msra.mxu0 %v1831_v5 }
 0x479   :  { %1730 = vmatprep.subr.bf16.mxu0 %v1959_v0 }
 0x47b   :  { %1677 = vmatpush3.bf16.msra.mxu1 %v1819_v44 }
 0x47c   :  { %1678 = vmatprep.subr.bf16.mxu1 %v1959_v0 }
 0x47f   :  { %1679 = vmatpush3.bf16.msra.mxu1 %v1820_v12 }
 0x480   :  { %1680 = vmatprep.subr.bf16.mxu1 %v1959_v0 }
 0x483   :  { %1681 = vmatpush3.bf16.msra.mxu1 %v1821_v45 }
 0x484   :  { %1682 = vmatprep.subr.bf16.mxu1 %v1959_v0 }
 0x487   :  { %1683 = vmatpush3.bf16.msra.mxu1 %v1822_v46 }
 0x488   :  { %1684 = vmatprep.subr.bf16.mxu1 %v1959_v0 }
 0x48b   :  { %1685 = vmatpush3.bf16.msra.mxu1 %v1823_v47  ;;  %v1422_v47 = vld [vmem:[#allocation7 + $0xa] ss:$0 sm:$0xff] }
 0x48c   :  { %1710 = vmatprep.subr.bf16.mxu1 %v1959_v0 }
 0x51a   :  { %v838_v51 = vpop.f32.mrf.mxu0 }
 0x51c   :  { %v1668_v52 = vpop.f32.mrf.mxu0 }
 0x51e   :  { %v841_v53 = vpop.f32.mrf.mxu0 }
 0x520   :  { %v1669_v54 = vpop.f32.mrf.mxu0 }
 0x52e   :  { %v750_v55 = vpop.f32.mrf.mxu1 }
 0x52f   :  { %v839_v57 = vadd.f32 %v838_v51, %v750_v55 }
 0x530   :  { %v1648_v58 = vpop.f32.mrf.mxu1 }
 0x531   :  { %v852_v59 = vadd.f32 %v1394_v56, %v839_v57 }
 0x532   :  { %v753_v60 = vpop.f32.mrf.mxu1 }
 0x533   :  { %1858 = vtanh.f32 %v852_v59 }
 0x534   :  { %v1649_v61 = vpop.f32.mrf.mxu1 }
 0x540   :  { %v1859_v62 = vpop.eup %1858 }
 0x541   :  { %v854_v63 = vpack.c.bf16 %v1859_v62, %v1859_v62 }
 0x543   :  { %1687 = vmatmul.mubr.bf16.vlgmr.msra.gmra.mxu1 %v854_v63 }
 0x544   :  { %1726 = vmatprep.mubr.msk.bf16.mxu1 %vm1960_vm0, %v1959_v0  ;;  %1711 = vmatpush3.bf16.msra.mxu1 %v1832_v6 }
 0x545   :  { %1712 = vmatprep.subr.bf16.mxu1 %v1959_v0 }
 0x548   :  { %1713 = vmatpush3.bf16.msra.mxu1 %v1833_v7 }
 0x549   :  { %1714 = vmatprep.subr.bf16.mxu1 %v1959_v0 }
 0x54c   :  { %1715 = vmatpush3.bf16.msra.mxu1 %v1834_v8 }
 0x54d   :  { %1716 = vmatprep.subr.bf16.mxu1 %v1959_v0 }
 0x550   :  { %1717 = vmatpush3.bf16.msra.mxu1 %v1835_v18 }
 0x551   :  { %1718 = vmatprep.subr.bf16.mxu1 %v1959_v0 }
 0x554   :  { %1719 = vmatpush3.bf16.msra.mxu1 %v1836_v19 }
 0x555   :  { %1720 = vmatprep.subr.bf16.mxu1 %v1959_v0 }
 0x558   :  { %1721 = vmatpush3.bf16.msra.mxu1 %v1837_v20 }
 0x559   :  { %1722 = vmatprep.subr.bf16.mxu1 %v1959_v0 }
 0x55c   :  { %1723 = vmatpush3.bf16.msra.mxu1 %v1838_v21 }
 0x55d   :  { %1724 = vmatprep.subr.bf16.mxu1 %v1959_v0 }
 0x560   :  { %1725 = vmatpush3.bf16.msra.mxu1 %v1839_v22 }
 0x603   :  { %v963_v10 = vpop.f32.mrf.mxu1 }
 0x604   :  { %v964_v11 = vadd.f32 %v1395_v9, %v963_v10 }
 0x605   :  { %v1688_v13 = vpop.f32.mrf.mxu1 }
 0x606   :  { %1860 = vtanh.f32 %v964_v11 }
 0x607   :  { %v966_v14 = vpop.f32.mrf.mxu1 }
 0x609   :  { %v1689_v15 = vpop.f32.mrf.mxu1 }
 0x613   :  { %v1861_v16 = vpop.eup %1860 }
 0x614   :  { %v970_v17 = vpack.c.bf16 %v1861_v16, %v1861_v16 }
 0x616   :  { %1707 = vmatmul.mubr.bf16.vlgmr.msra.gmra.mxu0 %v970_v17 }
 0x617   :  { %1746 = vmatprep.mubr.msk.bf16.mxu0 %vm1960_vm0, %v1959_v0  ;;  %1731 = vmatpush3.bf16.msra.mxu0 %v1840_v23 }
 0x618   :  { %1732 = vmatprep.subr.bf16.mxu0 %v1959_v0 }
 0x61b   :  { %1733 = vmatpush3.bf16.msra.mxu0 %v1841_v24 }
 0x61c   :  { %1734 = vmatprep.subr.bf16.mxu0 %v1959_v0 }
 0x61f   :  { %1735 = vmatpush3.bf16.msra.mxu0 %v1842_v25 }
 0x620   :  { %1736 = vmatprep.subr.bf16.mxu0 %v1959_v0 }
 0x623   :  { %1737 = vmatpush3.bf16.msra.mxu0 %v1843_v35 }
 0x624   :  { %1738 = vmatprep.subr.bf16.mxu0 %v1959_v0 }
 0x627   :  { %1739 = vmatpush3.bf16.msra.mxu0 %v1844_v36 }
 0x628   :  { %1740 = vmatprep.subr.bf16.mxu0 %v1959_v0 }
 0x62b   :  { %1741 = vmatpush3.bf16.msra.mxu0 %v1845_v37 }
 0x62c   :  { %1742 = vmatprep.subr.bf16.mxu0 %v1959_v0 }
 0x62f   :  { %1743 = vmatpush3.bf16.msra.mxu0 %v1846_v38 }
 0x630   :  { %1744 = vmatprep.subr.bf16.mxu0 %v1959_v0 }
 0x633   :  { %1745 = vmatpush3.bf16.msra.mxu0 %v1847_v39 }
 0x6d6   :  { %v1078_v27 = vpop.f32.mrf.mxu0 }
 0x6d7   :  { %v1079_v28 = vadd.f32 %v1404_v26, %v1078_v27 }
 0x6d8   :  { %v1708_v29 = vpop.f32.mrf.mxu0 }
 0x6d9   :  { %1862 = vtanh.f32 %v1079_v28 }
 0x6da   :  { %v1081_v30 = vpop.f32.mrf.mxu0 }
 0x6dc   :  { %v1709_v32 = vpop.f32.mrf.mxu0 }
 0x6e6   :  { %v1863_v33 = vpop.eup %1862 }
 0x6e7   :  { %v1085_v34 = vpack.c.bf16 %v1863_v33, %v1863_v33 }
 0x6e9   :  { %1727 = vmatmul.mubr.bf16.vlgmr.msra.gmra.mxu1 %v1085_v34 }
 0x7a9   :  { %v1193_v41 = vpop.f32.mrf.mxu1 }
 0x7aa   :  { %v1194_v42 = vadd.f32 %v1413_v40, %v1193_v41 }
 0x7ab   :  { %v1728_v43 = vpop.f32.mrf.mxu1 }
 0x7ac   :  { %1864 = vtanh.f32 %v1194_v42 }
 0x7ad   :  { %v1196_v44 = vpop.f32.mrf.mxu1 }
 0x7af   :  { %v1729_v12 = vpop.f32.mrf.mxu1 }
 0x7b9   :  { %v1865_v45 = vpop.eup %1864 }
 0x7ba   :  { %v1200_v46 = vpack.c.bf16 %v1865_v45, %v1865_v45 }
 0x7bc   :  { %1747 = vmatmul.mubr.bf16.vlgmr.msra.gmra.mxu0 %v1200_v46 }
 0x87c   :  { %v1308_v48 = vpop.f32.mrf.mxu0 }
 0x87d   :  { %v1309_v49 = vadd.f32 %v1422_v47, %v1308_v48 }
 0x87e   :  { %v1748_v50 = vpop.f32.mrf.mxu0 }
 0x87f   :  { %v1315_v0 = vadd.f32 %v1309_v49, %v2067_v31 }
 0x880   :  { %v1311_v51 = vpop.f32.mrf.mxu0 }
 0x881   :  { %1316 = vst [vmem:[#allocation8] sm:$0xff] %v1315_v0 }
 0x882   :  { %v1749_v52 = vpop.f32.mrf.mxu0 }
 0x883   :  { %1937 = shalt.err (!%p1934_p5)
}
 0x884   :  { %1326 = dma.vmem_to_hbm [thread:$0]  %s1324_s2, 128, %s2118_s3, [#allocation4]  }
 0x885   :  { %1950 = dma.done.wait [#allocation4], 128  }
 0x886   :  { %1951 = vsyncadd [#allocation4], 4294967168 }
 0x887   :  { %1330 = vsyncpa [#allocation3], 1 }
 0x888   :  { %1331 = vsyncpa [#allocation6], 1 }
 0x889   :  { %1332 = vsyncpa [#allocation4], 1 }

</bundles_post_ra>
